<compile_context>
chip_gen: v7x
topology: tpu7x:2x2x1
jax: 0.10.0
libtpu: 0.0.40
codegen_flags: <defaults>
</compile_context>

<pallas_src>
import functools

import jax
import jax.numpy as jnp
from jax import lax
from jax.experimental import pallas as pl
from jax.experimental.pallas import tpu as pltpu

LN_EPS = 1e-5


def _cdiv(a, b):
    return -(-a // b)


def _round_up(a, m):
    return _cdiv(a, m) * m


def head_kernel(x_ref, g_ref, beta_ref,
                w1_ref, b1_ref, w2_ref, b2_ref, w3t_ref, b3t_ref,
                o_ref):
    # LayerNorm over the embedding dim (biased variance, matching nn.LayerNorm).
    # Always done in f32.
    x = x_ref[...].astype(jnp.float32)
    mean = jnp.mean(x, axis=-1, keepdims=True)
    ctr = x - mean
    var = jnp.mean(ctr * ctr, axis=-1, keepdims=True)
    xn = ctr * lax.rsqrt(var + LN_EPS)
    xn = xn * g_ref[...].astype(jnp.float32) + beta_ref[...].astype(jnp.float32)

    # MXU operands in the input dtype (f32 here; bf16 if the caller streams bf16),
    # accumulation always f32.
    cdt = x_ref.dtype

    # Linear(E -> out_dim) + ReLU
    h1 = jnp.dot(xn.astype(cdt), w1_ref[...], preferred_element_type=jnp.float32)
    h1 = jnp.maximum(h1 + b1_ref[...].astype(jnp.float32), 0.0)

    # Linear(out_dim -> hidden) + ReLU
    h2 = jnp.dot(h1.astype(cdt), w2_ref[...], preferred_element_type=jnp.float32)
    h2 = jnp.maximum(h2 + b2_ref[...].astype(jnp.float32), 0.0)

    # Final Linear(hidden -> out_dim), computed directly transposed:
    #   h3t[o, t] = sum_k W3[k, o] * h2[t, k]  == (h2 @ W3)^T
    # NT contraction (last dim of both operands) -> lane-dense (out_dim, row_tile)
    # result for an unmasked, lane-dense store.
    h3t = lax.dot_general(w3t_ref[...], h2.astype(cdt),
                          dimension_numbers=(((1,), (1,)), ((), ())),
                          preferred_element_type=jnp.float32)
    h3t = h3t + b3t_ref[...].astype(jnp.float32)

    o_ref[...] = h3t.astype(o_ref.dtype)


@functools.partial(jax.jit, static_argnames=("box_n", "n_classes", "row_tile"))
def custom_head_cls(x, params, *, box_n=4, n_classes=3, row_tile=1024):
    """x: (B, S, E).  Returns (B, (S-1)*box_n, n_classes)."""
    B, S, E = x.shape
    out_dim = box_n * n_classes
    hid = params["w2"].shape[1]

    # Stream all B*S tokens (CLS rows included) -- this reshape is a free view,
    # so there is no HBM pre-copy for the CLS drop.  CLS outputs are discarded
    # after the kernel.
    N = B * S
    tokens = x.reshape(N, E)

    # Tile selection:
    #   * tiny inputs -> a single (sublane-aligned) block;
    #   * otherwise the biggest 128-aligned tile that (a) still yields >= 2 grid
    #     steps (keeps both v7x TensorCores busy), (b) respects the requested
    #     row_tile, and (c) keeps the double-buffered x block within ~8 MiB of
    #     VMEM regardless of E / dtype.
    # Boundary blocks may overhang N: rows are independent, overhang outputs are
    # discarded in the wrapper, so padded reads are harmless.
    if N <= 256:
        rt = _round_up(N, 32)                      # 32 covers f32/bf16/int8 sublane tiling
    else:
        bytes_per_row = E * jnp.dtype(x.dtype).itemsize
        vmem_cap = max(128, ((8 << 20) // max(1, 2 * bytes_per_row)) // 128 * 128)
        rt = max(128, min(_round_up(row_tile, 128),
                          _round_up(_cdiv(N, 2), 128),
                          vmem_cap))
    grid_n = _cdiv(N, rt)
    n_pad = grid_n * rt

    # Tiny one-time relayouts of the last-layer params (outside the kernel).
    w3t = params["w3"].T                  # (out_dim, hid)
    b3t = params["b3"].reshape(out_dim, 1)

    full = lambda i: (0, 0)               # parameters: same block every grid step

    out_t = pl.pallas_call(
        head_kernel,
        out_shape=jax.ShapeDtypeStruct((out_dim, n_pad), x.dtype),
        grid_spec=pltpu.PrefetchScalarGridSpec(
            num_scalar_prefetch=0,
            grid=(grid_n,),
            in_specs=[
                pl.BlockSpec((rt, E), lambda i: (i, 0)),   # token rows
                pl.BlockSpec((1, E), full),                # LN gamma
                pl.BlockSpec((1, E), full),                # LN beta
                pl.BlockSpec((E, out_dim), full),          # W1
                pl.BlockSpec((1, out_dim), full),          # b1
                pl.BlockSpec((out_dim, hid), full),        # W2
                pl.BlockSpec((1, hid), full),              # b2
                pl.BlockSpec((out_dim, hid), full),        # W3^T
                pl.BlockSpec((out_dim, 1), full),          # b3 (column)
            ],
            out_specs=pl.BlockSpec((out_dim, rt), lambda i: (0, i)),  # lane-dense
        ),
        compiler_params=pltpu.CompilerParams(
            dimension_semantics=("parallel",)),
    )(tokens,
      params["ln_g"], params["ln_b"],
      params["w1"], params["b1"],
      params["w2"], params["b2"],
      w3t, b3t)

    # Glue on tiny data: drop padding rows + CLS tokens, undo the transpose, and
    # apply the einops 'b e (an out) -> b (e an) out' rearrange (pure reshape).
    per_tok = out_t[:, :N].T.reshape(B, S, box_n, n_classes)
    return per_tok[:, 1:].reshape(B, (S - 1) * box_n, n_classes)


def init_params(key, emb_size, box_n, n_classes, hidden=256):
    out_dim = box_n * n_classes
    ks = jax.random.split(key, 6)
    scale = lambda fan_in: 1.0 / jnp.sqrt(fan_in)
    return {
        "ln_g": jnp.ones((1, emb_size), jnp.float32),
        "ln_b": jnp.zeros((1, emb_size), jnp.float32),
        "w1": jax.random.normal(ks[0], (emb_size, out_dim), jnp.float32) * scale(emb_size),
        "b1": jax.random.normal(ks[1], (1, out_dim), jnp.float32) * 0.01,
        "w2": jax.random.normal(ks[2], (out_dim, hidden), jnp.float32) * scale(out_dim),
        "b2": jax.random.normal(ks[3], (1, hidden), jnp.float32) * 0.01,
        "w3": jax.random.normal(ks[4], (hidden, out_dim), jnp.float32) * scale(hidden),
        "b3": jax.random.normal(ks[5], (1, out_dim), jnp.float32) * 0.01,
    }


def reference(x, params, box_n, n_classes):
    B, S, E = x.shape
    t = x[:, 1:, :]
    mean = jnp.mean(t, axis=-1, keepdims=True)
    var = jnp.mean((t - mean) ** 2, axis=-1, keepdims=True)
    tn = (t - mean) / jnp.sqrt(var + LN_EPS) * params["ln_g"][0] + params["ln_b"][0]
    h = jnp.maximum(tn @ params["w1"] + params["b1"][0], 0.0)
    h = jnp.maximum(h @ params["w2"] + params["b2"][0], 0.0)
    h = h @ params["w3"] + params["b3"][0]
    return h.reshape(B, (S - 1) * box_n, n_classes)


if __name__ == "__main__":
    BOX_N, N_CLS = 4, 3
    key = jax.random.PRNGKey(0)
    kx, kp, kx2, kp2 = jax.random.split(key, 4)

    # Case 1: small shapes consistent with the module (single-block path).
    B, S, EMB = 2, 9, 32
    x = jax.random.normal(kx, (B, S, EMB), jnp.float32)
    params = init_params(kp, EMB, BOX_N, N_CLS)
    out = jax.block_until_ready(custom_head_cls(x, params, box_n=BOX_N, n_classes=N_CLS))
    ref = reference(x, params, BOX_N, N_CLS)
    assert out.shape == (B, (S - 1) * BOX_N, N_CLS), out.shape
    assert jnp.allclose(out, ref, atol=1e-4, rtol=1e-4), "small-case mismatch vs reference"

    # Case 2: ViT-sized token count -> multi-step parallel grid, lane-dense
    # (12, rt) output blocks, and an overhanging boundary block (788 rows, tile 512).
    B2, S2, EMB2 = 4, 197, 64
    x2 = jax.random.normal(kx2, (B2, S2, EMB2), jnp.float32)
    params2 = init_params(kp2, EMB2, BOX_N, N_CLS)
    out2 = jax.block_until_ready(custom_head_cls(x2, params2, box_n=BOX_N, n_classes=N_CLS))
    ref2 = reference(x2, params2, BOX_N, N_CLS)
    assert out2.shape == (B2, (S2 - 1) * BOX_N, N_CLS), out2.shape
    assert jnp.allclose(out2, ref2, atol=1e-4, rtol=1e-4), "large-case mismatch vs reference"

    print("KERNEL_OK")
</pallas_src>

<mosaic_0001>
module attributes {stable_mosaic.version = 11 : i64} {
  func.func @head_kernel(%arg0: i32, %arg1: memref<32x32xf32, #tpu.memory_space<vmem>>, %arg2: memref<1x32xf32, #tpu.memory_space<vmem>>, %arg3: memref<1x32xf32, #tpu.memory_space<vmem>>, %arg4: memref<32x12xf32, #tpu.memory_space<vmem>>, %arg5: memref<1x12xf32, #tpu.memory_space<vmem>>, %arg6: memref<12x256xf32, #tpu.memory_space<vmem>>, %arg7: memref<1x256xf32, #tpu.memory_space<vmem>>, %arg8: memref<12x256xf32, #tpu.memory_space<vmem>>, %arg9: memref<12x1xf32, #tpu.memory_space<vmem>>, %arg10: memref<12x32xf32, #tpu.memory_space<vmem>>) attributes {dimension_semantics = [#tpu.dimension_semantics<parallel>], iteration_bounds = array<i64: 1>, scalar_prefetch = 0 : i64, scratch_operands = 0 : i64, tpu.core_type = #tpu.core_type<tc>, window_params = [{transform_indices = @transform_0, window_bounds = array<i64: 32, 32>}, {pipeline_mode = #tpu.pipeline_mode<synchronous>, transform_indices = @transform_1, window_bounds = array<i64: 1, 32>}, {pipeline_mode = #tpu.pipeline_mode<synchronous>, transform_indices = @transform_2, window_bounds = array<i64: 1, 32>}, {pipeline_mode = #tpu.pipeline_mode<synchronous>, transform_indices = @transform_3, window_bounds = array<i64: 32, 12>}, {pipeline_mode = #tpu.pipeline_mode<synchronous>, transform_indices = @transform_4, window_bounds = array<i64: 1, 12>}, {pipeline_mode = #tpu.pipeline_mode<synchronous>, transform_indices = @transform_5, window_bounds = array<i64: 12, 256>}, {pipeline_mode = #tpu.pipeline_mode<synchronous>, transform_indices = @transform_6, window_bounds = array<i64: 1, 256>}, {pipeline_mode = #tpu.pipeline_mode<synchronous>, transform_indices = @transform_7, window_bounds = array<i64: 12, 256>}, {pipeline_mode = #tpu.pipeline_mode<synchronous>, transform_indices = @transform_8, window_bounds = array<i64: 12, 1>}, {transform_indices = @transform_9, window_bounds = array<i64: 12, 32>}]} {
    %c0 = arith.constant 0 : index
    %c0_0 = arith.constant 0 : index
    %0 = vector.load %arg1[%c0, %c0_0] : memref<32x32xf32, #tpu.memory_space<vmem>>, vector<32x32xf32>
    %cst = arith.constant dense<0.000000e+00> : vector<32xf32>
    %1 = vector.multi_reduction <add>, %0, %cst [1] : vector<32x32xf32> to vector<32xf32>
    %2 = vector.shape_cast %1 : vector<32xf32> to vector<32x1xf32>
    %cst_1 = arith.constant 3.200000e+01 : f32
    %3 = vector.broadcast %cst_1 : f32 to vector<32x1xf32>
    %4 = arith.divf %2, %3 : vector<32x1xf32>
    %5 = vector.broadcast %4 : vector<32x1xf32> to vector<32x32xf32>
    %6 = arith.subf %0, %5 : vector<32x32xf32>
    %7 = arith.mulf %6, %6 : vector<32x32xf32>
    %cst_2 = arith.constant dense<0.000000e+00> : vector<32xf32>
    %8 = vector.multi_reduction <add>, %7, %cst_2 [1] : vector<32x32xf32> to vector<32xf32>
    %9 = vector.shape_cast %8 : vector<32xf32> to vector<32x1xf32>
    %cst_3 = arith.constant 3.200000e+01 : f32
    %10 = vector.broadcast %cst_3 : f32 to vector<32x1xf32>
    %11 = arith.divf %9, %10 : vector<32x1xf32>
    %cst_4 = arith.constant 9.99999974E-6 : f32
    %12 = vector.broadcast %cst_4 : f32 to vector<32x1xf32>
    %13 = arith.addf %11, %12 : vector<32x1xf32>
    %14 = math.rsqrt %13 : vector<32x1xf32>
    %15 = vector.broadcast %14 : vector<32x1xf32> to vector<32x32xf32>
    %16 = arith.mulf %6, %15 : vector<32x32xf32>
    %c0_5 = arith.constant 0 : index
    %c0_6 = arith.constant 0 : index
    %17 = vector.load %arg2[%c0_5, %c0_6] : memref<1x32xf32, #tpu.memory_space<vmem>>, vector<1x32xf32>
    %18 = vector.broadcast %17 : vector<1x32xf32> to vector<32x32xf32>
    %19 = arith.mulf %16, %18 : vector<32x32xf32>
    %c0_7 = arith.constant 0 : index
    %c0_8 = arith.constant 0 : index
    %20 = vector.load %arg3[%c0_7, %c0_8] : memref<1x32xf32, #tpu.memory_space<vmem>>, vector<1x32xf32>
    %21 = vector.broadcast %20 : vector<1x32xf32> to vector<32x32xf32>
    %22 = arith.addf %19, %21 : vector<32x32xf32>
    %c0_9 = arith.constant 0 : index
    %c0_10 = arith.constant 0 : index
    %23 = vector.load %arg4[%c0_9, %c0_10] : memref<32x12xf32, #tpu.memory_space<vmem>>, vector<32x12xf32>
    %cst_11 = arith.constant dense<0.000000e+00> : vector<32x12xf32>
    %24 = tpu.matmul %22, %23, %cst_11 {dimension_numbers = #tpu.dot_dimension_numbers<[1], [0], [0], [1], [0, 0, 1, 1], [], []>} : vector<32x32xf32>, vector<32x12xf32>, vector<32x12xf32> -> vector<32x12xf32>
    %c0_12 = arith.constant 0 : index
    %c0_13 = arith.constant 0 : index
    %25 = vector.load %arg5[%c0_12, %c0_13] : memref<1x12xf32, #tpu.memory_space<vmem>>, vector<1x12xf32>
    %26 = vector.broadcast %25 : vector<1x12xf32> to vector<32x12xf32>
    %27 = arith.addf %24, %26 : vector<32x12xf32>
    %cst_14 = arith.constant 0.000000e+00 : f32
    %28 = vector.broadcast %cst_14 : f32 to vector<32x12xf32>
    %29 = arith.maximumf %27, %28 : vector<32x12xf32>
    %c0_15 = arith.constant 0 : index
    %c0_16 = arith.constant 0 : index
    %30 = vector.load %arg6[%c0_15, %c0_16] : memref<12x256xf32, #tpu.memory_space<vmem>>, vector<12x256xf32>
    %cst_17 = arith.constant dense<0.000000e+00> : vector<32x256xf32>
    %31 = tpu.matmul %29, %30, %cst_17 {dimension_numbers = #tpu.dot_dimension_numbers<[1], [0], [0], [1], [0, 0, 1, 1], [], []>} : vector<32x12xf32>, vector<12x256xf32>, vector<32x256xf32> -> vector<32x256xf32>
    %c0_18 = arith.constant 0 : index
    %c0_19 = arith.constant 0 : index
    %32 = vector.load %arg7[%c0_18, %c0_19] : memref<1x256xf32, #tpu.memory_space<vmem>>, vector<1x256xf32>
    %33 = vector.broadcast %32 : vector<1x256xf32> to vector<32x256xf32>
    %34 = arith.addf %31, %33 : vector<32x256xf32>
    %cst_20 = arith.constant 0.000000e+00 : f32
    %35 = vector.broadcast %cst_20 : f32 to vector<32x256xf32>
    %36 = arith.maximumf %34, %35 : vector<32x256xf32>
    %c0_21 = arith.constant 0 : index
    %c0_22 = arith.constant 0 : index
    %37 = vector.load %arg8[%c0_21, %c0_22] : memref<12x256xf32, #tpu.memory_space<vmem>>, vector<12x256xf32>
    %cst_23 = arith.constant dense<0.000000e+00> : vector<12x32xf32>
    %38 = tpu.matmul %37, %36, %cst_23 {dimension_numbers = #tpu.dot_dimension_numbers<[1], [1], [0], [0], [0, 0, 1, 0], [], []>} : vector<12x256xf32>, vector<32x256xf32>, vector<12x32xf32> -> vector<12x32xf32>
    %c0_24 = arith.constant 0 : index
    %c0_25 = arith.constant 0 : index
    %39 = vector.load %arg9[%c0_24, %c0_25] : memref<12x1xf32, #tpu.memory_space<vmem>>, vector<12x1xf32>
    %40 = vector.broadcast %39 : vector<12x1xf32> to vector<12x32xf32>
    %41 = arith.addf %38, %40 : vector<12x32xf32>
    %c0_26 = arith.constant 0 : index
    %c0_27 = arith.constant 0 : index
    %42 = vector.load %arg10[%c0_26, %c0_27] : memref<12x32xf32, #tpu.memory_space<vmem>>, vector<12x32xf32>
    tpu.vector_store %arg10[%c0_26, %c0_27], %41 {strides = array<i32>} : memref<12x32xf32, #tpu.memory_space<vmem>>, vector<12x32xf32>,
    return
  }
  func.func @transform_0(%arg0: i32) -> (i32, i32) {
    %c0_i32 = arith.constant 0 : i32
    %c0_i32_0 = arith.constant 0 : i32
    return %arg0, %c0_i32 : i32, i32
  }
  func.func @transform_1(%arg0: i32) -> (i32, i32) {
    %c0_i32 = arith.constant 0 : i32
    %c0_i32_0 = arith.constant 0 : i32
    %c0_i32_1 = arith.constant 0 : i32
    return %c0_i32, %c0_i32_0 : i32, i32
  }
  func.func @transform_2(%arg0: i32) -> (i32, i32) {
    %c0_i32 = arith.constant 0 : i32
    %c0_i32_0 = arith.constant 0 : i32
    %c0_i32_1 = arith.constant 0 : i32
    return %c0_i32, %c0_i32_0 : i32, i32
  }
  func.func @transform_3(%arg0: i32) -> (i32, i32) {
    %c0_i32 = arith.constant 0 : i32
    %c0_i32_0 = arith.constant 0 : i32
    %c0_i32_1 = arith.constant 0 : i32
    return %c0_i32, %c0_i32_0 : i32, i32
  }
  func.func @transform_4(%arg0: i32) -> (i32, i32) {
    %c0_i32 = arith.constant 0 : i32
    %c0_i32_0 = arith.constant 0 : i32
    %c0_i32_1 = arith.constant 0 : i32
    return %c0_i32, %c0_i32_0 : i32, i32
  }
  func.func @transform_5(%arg0: i32) -> (i32, i32) {
    %c0_i32 = arith.constant 0 : i32
    %c0_i32_0 = arith.constant 0 : i32
    %c0_i32_1 = arith.constant 0 : i32
    return %c0_i32, %c0_i32_0 : i32, i32
  }
  func.func @transform_6(%arg0: i32) -> (i32, i32) {
    %c0_i32 = arith.constant 0 : i32
    %c0_i32_0 = arith.constant 0 : i32
    %c0_i32_1 = arith.constant 0 : i32
    return %c0_i32, %c0_i32_0 : i32, i32
  }
  func.func @transform_7(%arg0: i32) -> (i32, i32) {
    %c0_i32 = arith.constant 0 : i32
    %c0_i32_0 = arith.constant 0 : i32
    %c0_i32_1 = arith.constant 0 : i32
    return %c0_i32, %c0_i32_0 : i32, i32
  }
  func.func @transform_8(%arg0: i32) -> (i32, i32) {
    %c0_i32 = arith.constant 0 : i32
    %c0_i32_0 = arith.constant 0 : i32
    %c0_i32_1 = arith.constant 0 : i32
    return %c0_i32, %c0_i32_0 : i32, i32
  }
  func.func @transform_9(%arg0: i32) -> (i32, i32) {
    %c0_i32 = arith.constant 0 : i32
    %c0_i32_0 = arith.constant 0 : i32
    return %c0_i32, %arg0 : i32, i32
  }
}

</mosaic_0001>

<bundles_post_ra>
// kernel: custom_head_cls.1
= control target key start
LH: loop header
LB: loop body
LE: loop exit
PB: predicated region body
PF: predicated region fallthrough
CT: control target
= control target key end

     0   :  { %vm36_vm0 = vcmask 261120   ;;  %vm253_vm1 = vcmask 1043456   ;;  %vm525_vm2 = vmmov 1   ;;  %vm240_vm4 = vcmask 97280   ;;  %s667_s0 = inlined_call_operand.vmem [shape: f32[18,32], index: 0, kind: input, shape index: {}]   ;;  %s668_s3 = inlined_call_operand.vmem [shape: f32[32,12], index: 3, kind: input, shape index: {}]   ;;  %s669_s1 = inlined_call_operand.vmem [shape: f32[1,32], index: 1, kind: input, shape index: {}]   ;;  %s670_s2 = inlined_call_operand.vmem [shape: f32[1,32], index: 2, kind: input, shape index: {}]   ;;  %s671_s5 = inlined_call_operand.vmem [shape: f32[12,256], index: 5, kind: input, shape index: {}]   ;;  %s672_s4 = inlined_call_operand.vmem [shape: f32[1,12], index: 4, kind: input, shape index: {}]   ;;  %s673_s7 = inlined_call_operand.vmem [shape: f32[12,256], index: 7, kind: input, shape index: {}]   ;;  %s674_s8 = inlined_call_operand.vmem [shape: f32[12,1], index: 8, kind: input, shape index: {}]   ;;  %s675_s6 = inlined_call_operand.vmem [shape: f32[1,256], index: 6, kind: input, shape index: {}]   ;;  %s676_s9 = inlined_call_operand.vmem [shape: f32[12,32], index: 9, kind: output, shape index: {}]  }
   0x1   :  { %v32_v0 = vld [vmem:[%s667_s0] sm:$0xff]  ;;  %v34_v1 = vld [vmem:[%s667_s0 + $0x10] sm:$0xff]  ;;  %v33_v2 = vld [vmem:[%s667_s0 + $0x8] sm:$0xff]  ;;  %vm449_vm5 = vcmask 257024  }
   0x2   :  { %v37_v3 = vsel %vm36_vm0, %v32_v0, 0.0  ;;  %v43_v4 = vsel %vm36_vm0, %v34_v1, 0.0  ;;  %v35_v5 = vld [vmem:[%s667_s0 + $0x18] sm:$0xff]  ;;  %v40_v6 = vsel %vm36_vm0, %v33_v2, 0.0  ;;  %v112_v28 = vld [vmem:[%s668_s3] sm:$0xff]  ;;  %v113_v29 = vld [vmem:[%s668_s3 + $0x8] sm:$0xff] }
   0x3   :  { %38 = vadd.xlane.f32.xlu0 %v37_v3  ;;  %44 = vadd.xlane.f32.xlu1 %v43_v4  ;;  %v46_v7 = vsel %vm36_vm0, %v35_v5, 0.0  ;;  %v114_v30 = vld [vmem:[%s668_s3 + $0x10] sm:$0xff]  ;;  %v490_v31 = vpack.c.bf16 %v113_v29, %v112_v28  ;;  %v115_v32 = vld [vmem:[%s668_s3 + $0x18] sm:$0xff]  ;;  %v455_v47 = vld [vmem:[%s669_s1] ss:$0 sm:$0xff] }
   0x4   :  { %v494_v33 = vpack.c.bf16 %v115_v32, %v114_v30  ;;  %v456_v49 = vld [vmem:[%s670_s2] ss:$0 sm:$0xff]  ;;  %v226_v4 = vld [vmem:[%s671_s5 + $0x10] sm:$0xf]  ;;  %vm499_vm3 = vmpackc.low %vm253_vm1, %vm525_vm2 }
   0x5   :  { %491 = vmatprep.subr.bf16.mxu0 %v490_v31  ;;  %v224_v3 = vld [vmem:[%s671_s5] sm:$0xff] }
   0x6   :  { %493 = vmatpush3.bf16.msra.mxu0 %v490_v31 }
   0x7   :  { %41 = vadd.xlane.f32.xlu0 %v40_v6  ;;  %47 = vadd.xlane.f32.xlu1 %v46_v7  ;;  %v526_v6 = vmov 0.0   ;;  %v457_v7 = vld [vmem:[%s672_s4] ss:$0 sm:$0xff] }
   0x8   :  { %495 = vmatprep.subr.bf16.mxu0 %v494_v33  ;;  %324 = vmatprep.mubr.f32.mxu1 %v526_v6 }
   0xa   :  { %497 = vmatpush3.bf16.msra.mxu0 %v494_v33 }
  0x90   :  { %v39_v8 = vpop.xlane.xlu0 %38  ;;  %v45_v9 = vpop.xlane.xlu1 %44 }
  0x91   :  { %v50_v10 = vmul.f32 0.03125, %v39_v8  ;;  %v52_v11 = vmul.f32 0.03125, %v45_v9 }
  0x93   :  { %v54_v12 = vsub.f32 %v32_v0, %v50_v10  ;;  %v56_v13 = vsub.f32 %v34_v1, %v52_v11  ;;  %v225_v0 = vld [vmem:[%s671_s5 + $0x8] sm:$0xff]  ;;  %v227_v1 = vld [vmem:[%s671_s5 + $0x18] sm:$0xf] }
  0x94   :  { %v42_v14 = vpop.xlane.xlu0 %41  ;;  %v48_v15 = vpop.xlane.xlu1 %47 }
  0x95   :  { %v51_v16 = vmul.f32 0.03125, %v42_v14  ;;  %v53_v17 = vmul.f32 0.03125, %v48_v15  ;;  %v58_v18 = vmul.f32 %v54_v12, %v54_v12  ;;  %v60_v19 = vmul.f32 %v56_v13, %v56_v13 }
  0x97   :  { %v55_v20 = vsub.f32 %v33_v2, %v51_v16  ;;  %v57_v21 = vsub.f32 %v35_v5, %v53_v17  ;;  %v62_v22 = vsel %vm36_vm0, %v58_v18, 0.0  ;;  %v68_v23 = vsel %vm36_vm0, %v60_v19, 0.0 }
  0x98   :  { %63 = vadd.xlane.f32.xlu0 %v62_v22  ;;  %v498_v2 = vpack.c.bf16 %v227_v1, %v225_v0  ;;  %v501_v5 = vpack.c.bf16 %v226_v4, %v224_v3  ;;  %v361_v22 = vld [vmem:[%s674_s8] sm:$0xff] }
  0x99   :  { %v59_v24 = vmul.f32 %v55_v20, %v55_v20  ;;  %v61_v25 = vmul.f32 %v57_v21, %v57_v21 }
  0x9a   :  { %500 = vmatprep.subr.msk.bf16.mxu1 %vm499_vm3, %v498_v2 }
  0x9b   :  { %v65_v26 = vsel %vm36_vm0, %v59_v24, 0.0  ;;  %v71_v27 = vsel %vm36_vm0, %v61_v25, 0.0  ;;  %503 = vmatpush1.bf16.msk.msra.mxu1 %vm499_vm3, %v501_v5  ;;  %v230_v24 = vlaneseq }
  0x9c   :  { %69 = vadd.xlane.f32.xlu0 %v68_v23  ;;  %66 = vadd.xlane.f32.xlu1 %v65_v26  ;;  %v362_v23 = vld [vmem:[%s674_s8 + $0x8] sm:$0xf] }
  0x9d   :  { %v231_v25 = vshrl.u32 %v230_v24, 7 }
  0x9f   :  { %v232_v26 = vsub.s32 0, %v231_v25  ;;  %v236_v28 = vsub.s32 1, %v231_v25 }
  0xa0   :  { %72 = vadd.xlane.f32.xlu1 %v71_v27  ;;  %v228_v27 = vld [vmem:[%s675_s6] sm:$0x3] }
  0xa1   :  { %v233_v29 = vrot.slane %v228_v27, %v232_v26  ;;  %v237_v31 = vrot.slane %v228_v27, %v236_v28 }
 0x125   :  { %v64_v34 = vpop.xlane.xlu0 %63 }
 0x126   :  { %v74_v35 = vmul.f32 0.03125, %v64_v34 }
 0x128   :  { %v78_v36 = vadd.f32 1e-05, %v74_v35 }
 0x129   :  { %v67_v37 = vpop.xlane.xlu1 %66  ;;  %v70_v38 = vpop.xlane.xlu0 %69 }
 0x12a   :  { %517 = vrsqrt.f32 %v78_v36  ;;  %v75_v39 = vmul.f32 0.03125, %v67_v37  ;;  %v76_v40 = vmul.f32 0.03125, %v70_v38 }
 0x12c   :  { %v79_v41 = vadd.f32 1e-05, %v75_v39  ;;  %v80_v42 = vadd.f32 1e-05, %v76_v40 }
 0x12d   :  { %v73_v43 = vpop.xlane.xlu1 %72 }
 0x12e   :  { %519 = vrsqrt.f32 %v79_v41  ;;  %v77_v44 = vmul.f32 0.03125, %v73_v43 }
 0x12f   :  { %521 = vrsqrt.f32 %v80_v42 }
 0x130   :  { %v81_v45 = vadd.f32 1e-05, %v77_v44 }
 0x132   :  { %523 = vrsqrt.f32 %v81_v45 }
 0x134   :  { %v518_v46 = vpop.eup %517 }
 0x135   :  { %v86_v48 = vmul.f32 %v518_v46, %v54_v12 }
 0x137   :  { %v97_v50 = vmul.f32 %v455_v47, %v86_v48 }
 0x138   :  { %v520_v51 = vpop.eup %519 }
 0x139   :  { %v522_v52 = vpop.eup %521  ;;  %v108_v53 = vadd.f32 %v456_v49, %v97_v50  ;;  %v87_v54 = vmul.f32 %v520_v51, %v55_v20  ;;  %v358_v20 = vld [vmem:[%s673_s7 + $0x8] sm:$0xff] }
 0x13a   :  { %v88_v55 = vmul.f32 %v522_v52, %v56_v13 }
 0x13b   :  { %484 = vmatprep.mubr.msk.f32.mxu0 %vm36_vm0, %v108_v53  ;;  %v98_v56 = vmul.f32 %v455_v47, %v87_v54 }
 0x13c   :  { %v524_v57 = vpop.eup %523  ;;  %v99_v58 = vmul.f32 %v455_v47, %v88_v55 }
 0x13d   :  { %v109_v59 = vadd.f32 %v456_v49, %v98_v56  ;;  %v89_v60 = vmul.f32 %v524_v57, %v57_v21  ;;  %v527_v21 = vmov 0  }
 0x13e   :  { %v110_v61 = vadd.f32 %v456_v49, %v99_v58  ;;  %515 = vset.pattern.permute.xlu0 %v527_v21  ;;  %516 = vset.pattern.permute.xlu1 %v527_v21 }
 0x13f   :  { %485 = vmatmul.mubr.msk.f32.vlgmr.msra.gmra.mrb[0].mxu0 %vm36_vm0, %v109_v59  ;;  %v100_v62 = vmul.f32 %v455_v47, %v89_v60  ;;  %365 = vperm.xlu0 %515, %v361_v22   ;;  %v357_v59 = vld [vmem:[%s673_s7] sm:$0xff]  ;;  %v360_v60 = vld [vmem:[%s673_s7 + $0x18] sm:$0xf] }
 0x140   :  { %487 = vmatprep.mubr.msk.f32.mxu0 %vm36_vm0, %v110_v61  ;;  %370 = vperm.xlu1 %516, %v362_v23   ;;  %v359_v61 = vld [vmem:[%s673_s7 + $0x10] sm:$0xf] }
 0x141   :  { %v111_v63 = vadd.f32 %v456_v49, %v100_v62 }
 0x143   :  { %488 = vmatmul.mubr.msk.f32.gmra.mrb[2].mxu0 %vm36_vm0, %v111_v63 }
 0x1be   :  { %v366_v62 = vpop.permute.xlu0 %365 }
 0x1bf   :  { %v371_v2 = vpop.permute.xlu1 %370 }
 0x212   :  { %v486_v8 = vpop.f32.mrb[0].mxu0 }
 0x213   :  { %v201_v9 = vpop.f32.mrb[1].mxu0  ;;  %v207_v11 = vadd.f32 %v486_v8, %v457_v7 }
 0x214   :  { %v202_v10 = vadd.f32 %v457_v7, %v201_v9 }
 0x215   :  { %v221_v15 = vmax.f32 %v207_v11, 0.0 }
 0x216   :  { %v220_v12 = vmax.f32 %v202_v10, 0.0  ;;  %v489_v13 = vpop.f32.mrb[2].mxu0 }
 0x217   :  { %v211_v14 = vpop.f32.mrb[3].mxu0  ;;  %v217_v17 = vadd.f32 %v489_v13, %v457_v7 }
 0x218   :  { %464 = vmatmul.mubr.msk.f32.vlgmr.msra.gmra.mrb[0].mxu1 %vm240_vm4, %v220_v12  ;;  %v212_v16 = vadd.f32 %v457_v7, %v211_v14 }
 0x219   :  { %330 = vmatprep.mubr.f32.mxu1 %v526_v6  ;;  %v223_v19 = vmax.f32 %v217_v17, 0.0 }
 0x21a   :  { %v222_v18 = vmax.f32 %v212_v16, 0.0 }
 0x21c   :  { %465 = vmatmul.mubr.msk.f32.gmra.mrb[2].mxu1 %vm240_vm4, %v221_v15 }
 0x21d   :  { %336 = vmatprep.mubr.f32.mxu1 %v526_v6 }
 0x220   :  { %466 = vmatmul.mubr.msk.f32.gmra.mrb[4].mxu1 %vm240_vm4, %v222_v18 }
 0x221   :  { %342 = vmatprep.mubr.f32.mxu1 %v526_v6 }
 0x224   :  { %467 = vmatmul.mubr.msk.f32.gmra.mrb[6].mxu1 %vm240_vm4, %v223_v19 }
 0x225   :  { %437 = vmatprep.mubr.f32.mxu1 %v358_v20 }
 0x2eb   :  { %v326_v30 = vpop.f32.mrb[0].mxu1 }
 0x2ec   :  { %v328_v32 = vpop.f32.mrb[1].mxu1  ;;  %v327_v33 = vadd.f32 %v326_v30, %v233_v29 }
 0x2ed   :  { %v329_v34 = vadd.f32 %v328_v32, %v237_v31 }
 0x2ee   :  { %v349_v39 = vmax.f32 %v327_v33, 0.0 }
 0x2ef   :  { %v332_v35 = vpop.f32.mrb[2].mxu1  ;;  %v350_v41 = vmax.f32 %v329_v34, 0.0 }
 0x2f0   :  { %v333_v36 = vadd.f32 %v332_v35, %v233_v29  ;;  %v334_v37 = vpop.f32.mrb[3].mxu1 }
 0x2f1   :  { %v335_v38 = vadd.f32 %v334_v37, %v237_v31 }
 0x2f2   :  { %v351_v40 = vmax.f32 %v333_v36, 0.0 }
 0x2f3   :  { %v352_v42 = vmax.f32 %v335_v38, 0.0  ;;  %v338_v43 = vpop.f32.mrb[4].mxu1 }
 0x2f4   :  { %v506_v44 = vpack.c.bf16 %v351_v40, %v349_v39  ;;  %v340_v45 = vpop.f32.mrb[5].mxu1  ;;  %v339_v47 = vadd.f32 %v338_v43, %v233_v29 }
 0x2f5   :  { %v504_v46 = vpack.c.bf16 %v352_v42, %v350_v41  ;;  %v341_v48 = vadd.f32 %v340_v45, %v237_v31 }
 0x2f6   :  { %v353_v53 = vmax.f32 %v339_v47, 0.0 }
 0x2f7   :  { %v344_v49 = vpop.f32.mrb[6].mxu1  ;;  %505 = vmatprep.subr.bf16.mxu1 %v504_v46  ;;  %v354_v55 = vmax.f32 %v341_v48, 0.0 }
 0x2f8   :  { %v345_v50 = vadd.f32 %v344_v49, %v233_v29  ;;  %v346_v51 = vpop.f32.mrb[7].mxu1  ;;  %507 = vmatpush1.bf16.xpose.msra.mxu1 %v506_v44 }
 0x2f9   :  { %v347_v52 = vadd.f32 %v346_v51, %v237_v31 }
 0x2fa   :  { %v355_v54 = vmax.f32 %v345_v50, 0.0 }
 0x2fb   :  { %v356_v56 = vmax.f32 %v347_v52, 0.0 }
 0x2fc   :  { %v510_v57 = vpack.c.bf16 %v355_v54, %v353_v53 }
 0x2fd   :  { %v508_v58 = vpack.c.bf16 %v356_v56, %v354_v55 }
 0x2ff   :  { %509 = vmatprep.subr.bf16.mxu1 %v508_v58 }
 0x300   :  { %511 = vmatpush1.bf16.xpose.msra.mxu1 %v510_v57 }
 0x307   :  { %438 = vmatmul.mubr.f32.vlgmr.msra.gmra.mrb[8].mxu1 %v357_v59 }
 0x308   :  { %442 = vmatprep.mubr.f32.mxu1 %v360_v60 }
 0x30b   :  { %443 = vmatmul.mubr.f32.gmra.mrb[10].mxu1 %v359_v61 }
 0x3da   :  { %v439_v63 = vpop.f32.mrb[8].mxu1 }
 0x3db   :  { %v441_v0 = vpop.f32.mrb[9].mxu1  ;;  %v440_v1 = vadd.f32 %v439_v63, %v366_v62 }
 0x3dd   :  { %448 = vst.msk [vmem:[%s676_s9] sm:$0xff] %vm36_vm0, %v440_v1 }
 0x3de   :  { %v444_v3 = vpop.f32.mrb[10].mxu1 }
 0x3df   :  { %v445_v4 = vadd.f32 %v444_v3, %v371_v2  ;;  %v446_v5 = vpop.f32.mrb[11].mxu1 }
 0x3e1   :  { %450 = vst.msk [vmem:[%s676_s9 + $0x8] sm:$0xf] %vm449_vm5, %v445_v4 }

</bundles_post_ra>
